<compile_context>
chip_gen: v7x
topology: tpu7x:2x2x1
jax: 0.10.0
libtpu: 0.0.40
codegen_flags: <defaults>
</compile_context>

<pallas_src>
import functools

import jax
import jax.numpy as jnp
from jax.experimental import pallas as pl
from jax.experimental.pallas import tpu as pltpu

EPS = 1e-5
_LANE = 128
_CORE_SPLIT = 2   # pass-1 "parallel" axis width (engages both v7x TensorCores)


def _cdiv(a, b):
    return (a + b - 1) // b


def _round_down(x, m):
    return (x // m) * m


def _sublane_pack(dtype):
    """Packed sublane multiple for a dtype (f32: 8, bf16: 16, int8/fp8: 32)."""
    return max(8, 32 // jnp.dtype(dtype).itemsize)


def _chip_tuning():
    """Per-generation (tile_bytes, fused_max_bytes, vmem_limit_bytes)."""
    kind = ""
    try:
        kind = jax.devices()[0].device_kind.lower()
    except Exception:
        pass
    if "v7" in kind or "7x" in kind:
        # 64 MiB physical VMEM but ~3.2 TB/s HBM: bigger tiles hide the
        # ~0.35us per-grid-step overhead; stay well under the physical limit.
        return 8 * 1024 * 1024, 8 * 1024 * 1024, 48 * 1024 * 1024
    if "v6" in kind or "v5p" in kind:
        return 4 * 1024 * 1024, 8 * 1024 * 1024, 64 * 1024 * 1024
    # v5e / unknown: fit the 16 MiB default scoped-VMEM limit.
    return 2 * 1024 * 1024, 3 * 1024 * 1024, None


# --------------------------- kernels ----------------------------------------


def _fused_kernel(z_ref, a_ref, b_ref, o_ref, *, n, eps):
    """Whole tensor resident in VMEM: stats + normalize in one pass."""
    z = z_ref[...].astype(jnp.float32)
    mu = jnp.sum(z, keepdims=True) / n                       # (1, 1)
    centered = z - mu
    var = jnp.sum(centered * centered, keepdims=True) / (n - 1.0)  # unbiased
    inv = 1.0 / (jnp.sqrt(var) + eps)                        # (1, 1)
    o_ref[...] = (centered * inv * a_ref[...].astype(jnp.float32)
                  + b_ref[...].astype(jnp.float32)).astype(o_ref.dtype)


def _reduce_kernel(c_ref, z_ref, sum_ref, sq_ref, *,
                   total_rows, tile_rows, tiles_per_core):
    """Per-core, lane-wide partial sums of (z - c) and (z - c)^2."""
    j = pl.program_id(1)

    @pl.when(j == 0)
    def _():
        sum_ref[...] = jnp.zeros_like(sum_ref)
        sq_ref[...] = jnp.zeros_like(sq_ref)

    tile_idx = pl.program_id(0) * tiles_per_core + j
    rows_left = total_rows - tile_idx * tile_rows            # <=0 for OOB tiles
    zt = z_ref[...].astype(jnp.float32) - c_ref[...]         # (1,1) broadcast
    row_ids = jax.lax.broadcasted_iota(jnp.int32, zt.shape, 0)
    zt = jnp.where(row_ids < rows_left, zt, 0.0)             # mask tail rows
    sum_ref[...] += jnp.sum(zt, axis=0, keepdims=True)[None]
    sq_ref[...] += jnp.sum(zt * zt, axis=0, keepdims=True)[None]


def _normalize_kernel(z_ref, scale_ref, shift_ref, o_ref):
    """out = z * scale + shift (mu and 1/(sigma+eps) already folded in)."""
    o_ref[...] = (z_ref[...].astype(jnp.float32) * scale_ref[...]
                  + shift_ref[...]).astype(o_ref.dtype)


# --------------------------- pallas_call wrappers ----------------------------


def _fused(z, a2, b2, eps, vmem_limit):
    B, H = z.shape
    kernel = functools.partial(_fused_kernel, n=float(B * H), eps=float(eps))
    return pl.pallas_call(
        kernel,
        out_shape=jax.ShapeDtypeStruct((B, H), z.dtype),
        grid=(1,),
        in_specs=[pl.BlockSpec((B, H), lambda i: (0, 0)),
                  pl.BlockSpec((1, H), lambda i: (0, 0)),
                  pl.BlockSpec((1, H), lambda i: (0, 0))],
        out_specs=pl.BlockSpec((B, H), lambda i: (0, 0)),
        compiler_params=pltpu.CompilerParams(
            dimension_semantics=("arbitrary",), vmem_limit_bytes=vmem_limit),
        cost_estimate=pl.CostEstimate(
            flops=6 * B * H, transcendentals=1,
            bytes_accessed=2 * B * H * jnp.dtype(z.dtype).itemsize),
    )(z, a2, b2)


def _partial_sums(z2d, c, tile_rows, vmem_limit):
    """z2d: (R, C); returns f32 scalars (sum(z-c), sum((z-c)^2))."""
    rows, cols = z2d.shape
    n_tiles = _cdiv(rows, tile_rows)
    tiles_per_core = _cdiv(n_tiles, _CORE_SPLIT)
    last_tile = n_tiles - 1

    def z_map(i, j):  # clamp fully-OOB tile indices (masked to 0 in-kernel)
        return (jnp.minimum(i * tiles_per_core + j, last_tile), 0)

    kernel = functools.partial(_reduce_kernel, total_rows=rows,
                               tile_rows=tile_rows,
                               tiles_per_core=tiles_per_core)
    psum, psq = pl.pallas_call(
        kernel,
        out_shape=(jax.ShapeDtypeStruct((_CORE_SPLIT, 1, cols), jnp.float32),
                   jax.ShapeDtypeStruct((_CORE_SPLIT, 1, cols), jnp.float32)),
        grid=(_CORE_SPLIT, tiles_per_core),
        in_specs=[pl.BlockSpec((1, 1), lambda i, j: (0, 0)),   # shift c
                  pl.BlockSpec((tile_rows, cols), z_map)],
        out_specs=[pl.BlockSpec((1, 1, cols), lambda i, j: (i, 0, 0)),
                   pl.BlockSpec((1, 1, cols), lambda i, j: (i, 0, 0))],
        compiler_params=pltpu.CompilerParams(
            dimension_semantics=("parallel", "arbitrary"),
            vmem_limit_bytes=vmem_limit),
        cost_estimate=pl.CostEstimate(
            flops=4 * rows * cols, transcendentals=0,
            bytes_accessed=rows * cols * jnp.dtype(z2d.dtype).itemsize),
    )(c, z2d)
    return jnp.sum(psum), jnp.sum(psq)


def _normalize(z2d, scale, shift, tile_rows, vmem_limit):
    """z2d: (R, C); scale/shift: (1, C) f32; OOB tail writes are dropped."""
    rows, cols = z2d.shape
    itemsize = jnp.dtype(z2d.dtype).itemsize
    return pl.pallas_call(
        _normalize_kernel,
        out_shape=jax.ShapeDtypeStruct((rows, cols), z2d.dtype),
        grid=(_cdiv(rows, tile_rows),),
        in_specs=[pl.BlockSpec((tile_rows, cols), lambda i: (i, 0)),
                  pl.BlockSpec((1, cols), lambda i: (0, 0)),
                  pl.BlockSpec((1, cols), lambda i: (0, 0))],
        out_specs=pl.BlockSpec((tile_rows, cols), lambda i: (i, 0)),
        compiler_params=pltpu.CompilerParams(
            dimension_semantics=("parallel",), vmem_limit_bytes=vmem_limit),
        cost_estimate=pl.CostEstimate(
            flops=2 * rows * cols, transcendentals=0,
            bytes_accessed=2 * rows * cols * itemsize),
    )(z2d, scale, shift)


# --------------------------- public entry point ------------------------------


def layer_normalization(z, a2, b2, eps=EPS, *, force_tiled=False,
                        tile_bytes=None):
    """z: (B, H); a2, b2: (1, H).  Matches the PyTorch forward exactly."""
    B, H = z.shape
    N = B * H
    itemsize = jnp.dtype(z.dtype).itemsize
    tile_bytes_default, fused_max_bytes, vmem_limit = _chip_tuning()
    if tile_bytes is None:
        tile_bytes = tile_bytes_default

    # ----- Fused single-kernel path: one HBM read + one write ---------------
    if not force_tiled and N * itemsize <= fused_max_bytes:
        return _fused(z, a2, b2, eps, vmem_limit)

    # ----- Tiled two-pass path -----------------------------------------------
    pack = _sublane_pack(z.dtype)
    a2f = a2.astype(jnp.float32).reshape(1, H)
    b2f = b2.astype(jnp.float32).reshape(1, H)
    # Shift for a numerically-stable sum of squares (single tiny HBM read).
    c = z[0:1, 0:1].astype(jnp.float32)

    lane_dense = (N % _LANE == 0)          # reshape view is a free bitcast
    z_red = z.reshape(N // _LANE, _LANE) if lane_dense else z
    rows, cols = z_red.shape
    tile_rows = max(pack, _round_down(tile_bytes // max(1, cols * itemsize), pack))
    tile_rows = min(tile_rows, rows)

    # Pass 1: global reduction (2-way parallel split + lane-wide accumulators).
    s1, s2 = _partial_sums(z_red, c, tile_rows, vmem_limit)

    # Tiny scalar / (1, H) math between the passes.
    n = jnp.float32(N)
    mean_c = s1 / n                                  # mean of (z - c)
    mu = c[0, 0] + mean_c
    var = jnp.maximum((s2 - s1 * mean_c) / (n - 1.0), 0.0)   # unbiased
    inv = 1.0 / (jnp.sqrt(var) + jnp.float32(eps))
    scale = a2f * inv                                # (1, H)
    shift = b2f - mu * scale                         # (1, H)

    # Pass 2: pipelined elementwise normalize.
    if lane_dense and _LANE % H == 0:
        # Lane-dense slab path (small hidden sizes): pre-tile scale/shift to a
        # full 128-lane row so every store is an unmasked vst; output reshape
        # back to (B, H) is free (no pad, no slice).
        reps = _LANE // H
        out = _normalize(z_red, jnp.tile(scale, (1, reps)),
                         jnp.tile(shift, (1, reps)), tile_rows, vmem_limit)
        return out.reshape(B, H)

    # Direct (B, H) row tiles: last dim equals the full dim, legal for any H.
    tile_b = min(B, max(pack, _round_down(tile_bytes // max(1, H * itemsize), pack)))
    return _normalize(z, scale, shift, tile_b, vmem_limit)


# --------------------------- reference & demo ---------------------------------


def _reference(z, a2, b2, eps=EPS):
    zf = z.astype(jnp.float32)
    mu = jnp.mean(zf)
    sigma = jnp.std(zf, ddof=1)  # unbiased, matches torch.std default
    return (zf - mu) / (sigma + eps) * a2.astype(jnp.float32) + b2.astype(jnp.float32)


if __name__ == "__main__":
    key = jax.random.PRNGKey(0)

    # 1) Module-consistent demo shape (hidden=32) with the module's init.
    batch, hidden = 8, 32
    z = jax.random.normal(jax.random.fold_in(key, 0), (batch, hidden),
                          dtype=jnp.float32)
    a2 = jnp.ones((1, hidden), dtype=jnp.float32)
    b2 = jnp.zeros((1, hidden), dtype=jnp.float32)
    out = jax.block_until_ready(layer_normalization(z, a2, b2))
    assert out.shape == (batch, hidden)
    assert jnp.allclose(out, _reference(z, a2, b2), atol=1e-5, rtol=1e-5)

    # 2) More fused-path coverage (random affine params, ragged hidden).
    for i, (b_, h_) in enumerate([(16, 128), (6, 100)]):
        k1, k2, k3 = jax.random.split(jax.random.fold_in(key, i + 1), 3)
        z_ = jax.random.normal(k1, (b_, h_), dtype=jnp.float32)
        a_ = jax.random.normal(k2, (1, h_), dtype=jnp.float32)
        bb_ = jax.random.normal(k3, (1, h_), dtype=jnp.float32)
        o_ = jax.block_until_ready(layer_normalization(z_, a_, bb_))
        assert o_.shape == (b_, h_)
        assert jnp.allclose(o_, _reference(z_, a_, bb_), atol=1e-5, rtol=1e-5)

    # 3) Tiled two-pass coverage (small tile_bytes forces multi-tile grids):
    #    (576, 64)  f32  -> lane-dense slab, odd tile count (exercises the
    #                       2-way core split with a fully-masked tail tile)
    #    (300, 100) f32  -> ragged hidden, direct (B, H) tiles + tail masking
    #    (256, 64)  bf16 -> 16-sublane packing
    tiled_cases = [((576, 64), jnp.float32, 1e-4),
                   ((300, 100), jnp.float32, 1e-4),
                   ((256, 64), jnp.bfloat16, 5e-2)]
    for i, ((b_, h_), dt, tol) in enumerate(tiled_cases):
        k1, k2, k3 = jax.random.split(jax.random.fold_in(key, 100 + i), 3)
        z_ = jax.random.normal(k1, (b_, h_), dtype=jnp.float32).astype(dt)
        a_ = jax.random.normal(k2, (1, h_), dtype=jnp.float32)
        bb_ = jax.random.normal(k3, (1, h_), dtype=jnp.float32)
        o_ = jax.block_until_ready(
            layer_normalization(z_, a_, bb_, force_tiled=True, tile_bytes=16384))
        assert o_.shape == (b_, h_) and o_.dtype == dt
        assert jnp.allclose(o_.astype(jnp.float32), _reference(z_, a_, bb_),
                            atol=tol, rtol=tol), f"mismatch {(b_, h_, dt)}"

    print("KERNEL_OK")
</pallas_src>

<mosaic_0001>
module attributes {stable_mosaic.version = 11 : i64} {
  func.func @_fused_kernel(%arg0: i32, %arg1: memref<8x32xf32, #tpu.memory_space<vmem>>, %arg2: memref<1x32xf32, #tpu.memory_space<vmem>>, %arg3: memref<1x32xf32, #tpu.memory_space<vmem>>, %arg4: memref<8x32xf32, #tpu.memory_space<vmem>>) attributes {dimension_semantics = [#tpu.dimension_semantics<arbitrary>], iteration_bounds = array<i64: 1>, scalar_prefetch = 0 : i64, scratch_operands = 0 : i64, tpu.core_type = #tpu.core_type<tc>, window_params = [{pipeline_mode = #tpu.pipeline_mode<synchronous>, transform_indices = @transform_0, window_bounds = array<i64: 8, 32>}, {pipeline_mode = #tpu.pipeline_mode<synchronous>, transform_indices = @transform_1, window_bounds = array<i64: 1, 32>}, {pipeline_mode = #tpu.pipeline_mode<synchronous>, transform_indices = @transform_2, window_bounds = array<i64: 1, 32>}, {pipeline_mode = #tpu.pipeline_mode<synchronous>, transform_indices = @transform_3, window_bounds = array<i64: 8, 32>}]} {
    %c0 = arith.constant 0 : index
    %c0_0 = arith.constant 0 : index
    %0 = vector.load %arg1[%c0, %c0_0] : memref<8x32xf32, #tpu.memory_space<vmem>>, vector<8x32xf32>
    %1 = vector.shape_cast %0 : vector<8x32xf32> to vector<1x8x32xf32>
    %cst = arith.constant dense<0.000000e+00> : vector<1xf32>
    %2 = vector.multi_reduction <add>, %1, %cst [1, 2] : vector<1x8x32xf32> to vector<1xf32>
    %3 = vector.shape_cast %2 : vector<1xf32> to vector<1x1x1xf32>
    %4 = vector.extract %3[0, 0, 0] : f32 from vector<1x1x1xf32>
    %5 = vector.broadcast %4 : f32 to vector<1x1xf32>
    %cst_1 = arith.constant 2.560000e+02 : f32
    %6 = vector.broadcast %cst_1 : f32 to vector<1x1xf32>
    %7 = arith.divf %5, %6 : vector<1x1xf32>
    %8 = vector.broadcast %7 : vector<1x1xf32> to vector<8x32xf32>
    %9 = arith.subf %0, %8 : vector<8x32xf32>
    %10 = arith.mulf %9, %9 : vector<8x32xf32>
    %11 = vector.shape_cast %10 : vector<8x32xf32> to vector<1x8x32xf32>
    %cst_2 = arith.constant dense<0.000000e+00> : vector<1xf32>
    %12 = vector.multi_reduction <add>, %11, %cst_2 [1, 2] : vector<1x8x32xf32> to vector<1xf32>
    %13 = vector.shape_cast %12 : vector<1xf32> to vector<1x1x1xf32>
    %14 = vector.extract %13[0, 0, 0] : f32 from vector<1x1x1xf32>
    %15 = vector.broadcast %14 : f32 to vector<1x1xf32>
    %cst_3 = arith.constant 2.550000e+02 : f32
    %16 = vector.broadcast %cst_3 : f32 to vector<1x1xf32>
    %17 = arith.divf %15, %16 : vector<1x1xf32>
    %18 = math.sqrt %17 : vector<1x1xf32>
    %cst_4 = arith.constant 9.99999974E-6 : f32
    %19 = vector.broadcast %cst_4 : f32 to vector<1x1xf32>
    %20 = arith.addf %18, %19 : vector<1x1xf32>
    %cst_5 = arith.constant 1.000000e+00 : f32
    %21 = vector.broadcast %cst_5 : f32 to vector<1x1xf32>
    %22 = arith.divf %21, %20 : vector<1x1xf32>
    %23 = vector.broadcast %22 : vector<1x1xf32> to vector<8x32xf32>
    %24 = arith.mulf %9, %23 : vector<8x32xf32>
    %c0_6 = arith.constant 0 : index
    %c0_7 = arith.constant 0 : index
    %25 = vector.load %arg2[%c0_6, %c0_7] : memref<1x32xf32, #tpu.memory_space<vmem>>, vector<1x32xf32>
    %26 = vector.broadcast %25 : vector<1x32xf32> to vector<8x32xf32>
    %27 = arith.mulf %24, %26 : vector<8x32xf32>
    %c0_8 = arith.constant 0 : index
    %c0_9 = arith.constant 0 : index
    %28 = vector.load %arg3[%c0_8, %c0_9] : memref<1x32xf32, #tpu.memory_space<vmem>>, vector<1x32xf32>
    %29 = vector.broadcast %28 : vector<1x32xf32> to vector<8x32xf32>
    %30 = arith.addf %27, %29 : vector<8x32xf32>
    %c0_10 = arith.constant 0 : index
    %c0_11 = arith.constant 0 : index
    %31 = vector.load %arg4[%c0_10, %c0_11] : memref<8x32xf32, #tpu.memory_space<vmem>>, vector<8x32xf32>
    tpu.vector_store %arg4[%c0_10, %c0_11], %30 {strides = array<i32>} : memref<8x32xf32, #tpu.memory_space<vmem>>, vector<8x32xf32>,
    return
  }
  func.func @transform_0(%arg0: i32) -> (i32, i32) {
    %c0_i32 = arith.constant 0 : i32
    %c0_i32_0 = arith.constant 0 : i32
    %c0_i32_1 = arith.constant 0 : i32
    return %c0_i32, %c0_i32_0 : i32, i32
  }
  func.func @transform_1(%arg0: i32) -> (i32, i32) {
    %c0_i32 = arith.constant 0 : i32
    %c0_i32_0 = arith.constant 0 : i32
    %c0_i32_1 = arith.constant 0 : i32
    return %c0_i32, %c0_i32_0 : i32, i32
  }
  func.func @transform_2(%arg0: i32) -> (i32, i32) {
    %c0_i32 = arith.constant 0 : i32
    %c0_i32_0 = arith.constant 0 : i32
    %c0_i32_1 = arith.constant 0 : i32
    return %c0_i32, %c0_i32_0 : i32, i32
  }
  func.func @transform_3(%arg0: i32) -> (i32, i32) {
    %c0_i32 = arith.constant 0 : i32
    %c0_i32_0 = arith.constant 0 : i32
    %c0_i32_1 = arith.constant 0 : i32
    return %c0_i32, %c0_i32_0 : i32, i32
  }
}

</mosaic_0001>

<bundles_post_ra>
// kernel: tpu_custom_call.1
= control target key start
LH: loop header
LB: loop body
LE: loop exit
PB: predicated region body
PF: predicated region fallthrough
CT: control target
= control target key end

     0   :  { %8 = vsyncpa [#allocation3], 0  ;;  %s215_s0 = inlined_call_operand.hbm [shape: f32[8,32], index: 0, kind: input, shape index: {}]   ;;  %s216_s1 = inlined_call_operand.vmem [shape: f32[1,32], index: 1, kind: input, shape index: {}]   ;;  %s217_s2 = inlined_call_operand.vmem [shape: f32[1,32], index: 2, kind: input, shape index: {}]   ;;  %s218_s3 = inlined_call_operand.hbm [shape: f32[8,32], index: 3, kind: output, shape index: {}]  }
   0x1   :  { %9 = vsyncpa [#allocation4], 0  ;;  %s160_s12 = smov [#allocation2]   ;;  %s112_s16 = scalar_lea.hbm %s215_s0, 128 }
   0x2   :  { %s16_s13 = sshll.u32 %s160_s12, 4  ;;  %p113_p0 = scmp.ne.s32.totalorder %s215_s0, %s112_s16  ;;  %s17_s13 = int_to_ptr.vmem [resolvable:$true] %s16_s13 }
   0x3   :  { %p116_p1 = scmp.lt.u32.totalorder %s112_s16, %s215_s0 }
   0x5   :  { %p118_p2 = pnand %p116_p1, %p113_p0 }
   0x7   :  { %121 = shalt.err (!%p118_p2)
}
   0x8   :  { %s122_s21 = scalar_lea.vmem %s17_s13, 128  ;;  %p127_p4 = scmp.lt.s32.totalorder %s17_s13, %s17_s13 }
   0x9   :  { %p123_p3 = scmp.ne.s32.totalorder %s17_s13, %s122_s21  ;;  %p128_p5 = scmp.lt.s32.totalorder %s122_s21, %s122_s21 }
   0xb   :  { %p129_p6 = por %p128_p5, %p127_p4 }
   0xd   :  { %p130_p7 = pnand %p129_p6, %p123_p3 }
   0xf   :  { %133 = shalt.err (!%p130_p7)
}
  0x10   :  { %19 = dma.hbm_to_vmem [thread:$0]  %s215_s0, 128, %s17_s13, [#allocation3]  }
  0x11   :  { %156 = dma.done.wait [#allocation3], 128  }
  0x12   :  { %157 = vsyncadd [#allocation3], 4294967168  ;;  %vm28_vm0 = vcmask 261120   ;;  %v27_v0 = vld [vmem:[#allocation2] sm:$0xff]  ;;  %s161_s29 = smov [#allocation5]  }
  0x13   :  { %v29_v1 = vsel %vm28_vm0, %v27_v0, 0.0  ;;  %v100_v30 = vld [vmem:[%s216_s1] ss:$0 sm:$0xff]  ;;  %s91_s30 = sshll.u32 %s161_s29, 4  ;;  %s92_s30 = int_to_ptr.vmem [resolvable:$true] %s91_s30 }
  0x14   :  { %30 = vadd.xlane.f32.xlu0 %v29_v1  ;;  %v101_v32 = vld [vmem:[%s217_s2] ss:$0 sm:$0xff]  ;;  %s134_s4 = scalar_lea.vmem %s92_s30, 128  ;;  %p139_p9 = scmp.lt.s32.totalorder %s92_s30, %s92_s30 }
  0x15   :  { %p135_p8 = scmp.ne.s32.totalorder %s92_s30, %s134_s4  ;;  %p140_p10 = scmp.lt.s32.totalorder %s134_s4, %s134_s4 }
  0x17   :  { %p141_p11 = por %p140_p10, %p139_p9 }
  0x19   :  { %p142_p12 = pnand %p141_p11, %p135_p8 }
  0xa1   :  { %v31_v2 = vpop.xlane.xlu0 %30 }
  0xa2   :  { %v32_v3 = vrot.slane %v31_v2, 4 }
  0xa4   :  { %v33_v4 = vadd.f32 %v32_v3, %v31_v2 }
  0xa6   :  { %v34_v5 = vrot.slane %v33_v4, 2 }
  0xa8   :  { %v35_v6 = vadd.f32 %v34_v5, %v33_v4 }
  0xaa   :  { %v36_v7 = vrot.slane %v35_v6, 1 }
  0xac   :  { %v37_v8 = vadd.f32 %v36_v7, %v35_v6 }
  0xae   :  { %102 = vpush %v37_v8 }
  0xdf   :  { %s103_s24 = spop %102 }
  0xe0   :  { %v39_v9 = vstv %s103_s24 }
  0xe1   :  { %v41_v10 = vmul.f32 0.00390625, %v39_v9 }
  0xe3   :  { %v42_v11 = vsub.f32 %v27_v0, %v41_v10 }
  0xe5   :  { %v43_v12 = vmul.f32 %v42_v11, %v42_v11 }
  0xe7   :  { %v44_v13 = vsel %vm28_vm0, %v43_v12, 0.0 }
  0xe8   :  { %45 = vadd.xlane.f32.xlu0 %v44_v13 }
 0x175   :  { %v46_v14 = vpop.xlane.xlu0 %45 }
 0x176   :  { %v47_v15 = vrot.slane %v46_v14, 4 }
 0x178   :  { %v48_v16 = vadd.f32 %v47_v15, %v46_v14 }
 0x17a   :  { %v49_v17 = vrot.slane %v48_v16, 2 }
 0x17c   :  { %v50_v18 = vadd.f32 %v49_v17, %v48_v16 }
 0x17e   :  { %v51_v19 = vrot.slane %v50_v18, 1 }
 0x180   :  { %v52_v20 = vadd.f32 %v51_v19, %v50_v18 }
 0x182   :  { %104 = vpush %v52_v20 }
 0x1b3   :  { %s105_s0 = spop %104 }
 0x1b4   :  { %v54_v21 = vstv %s105_s0 }
 0x1b5   :  { %v56_v22 = vmul.f32 0.003921569, %v54_v21 }
 0x1b7   :  { %108 = vrsqrt.f32 %v56_v22  ;;  %vm59_vm1 = vcmp.eq.f32.partialorder %v56_v22, inf  ;;  %v62_v25 = vand.u32 2147483648, %v56_v22  ;;  %vm61_vm2 = vcmp.eq.f32.partialorder %v56_v22, 0.0 }
 0x1c1   :  { %v109_v23 = vpop.eup %108 }
 0x1c2   :  { %v58_v24 = vmul.f32 %v109_v23, %v56_v22 }
 0x1c4   :  { %v60_v26 = vsel %vm59_vm1, %v56_v22, %v58_v24 }
 0x1c5   :  { %v63_v27 = vsel %vm61_vm2, %v62_v25, %v60_v26 }
 0x1c6   :  { %v64_v28 = vadd.f32 1e-05, %v63_v27 }
 0x1c8   :  { %110 = vrcp.f32 %v64_v28 }
 0x1d2   :  { %v111_v29 = vpop.eup %110 }
 0x1d3   :  { %v67_v31 = vmul.f32 %v111_v29, %v42_v11 }
 0x1d5   :  { %v75_v33 = vmul.f32 %v100_v30, %v67_v31 }
 0x1d7   :  { %v83_v34 = vadd.f32 %v101_v32, %v75_v33 }
 0x1d9   :  { %84 = vst.msk [vmem:[#allocation5] sm:$0xff] %vm28_vm0, %v83_v34 }
 0x1da   :  { %145 = shalt.err (!%p142_p12)
}
 0x1db   :  { %s146_s6 = scalar_lea.hbm %s218_s3, 128 }
 0x1dc   :  { %p147_p13 = scmp.ne.s32.totalorder %s218_s3, %s146_s6  ;;  %p150_p0 = scmp.lt.u32.totalorder %s146_s6, %s218_s3 }
 0x1de   :  { %p152_p1 = pnand %p150_p0, %p147_p13 }
 0x1e0   :  { %155 = shalt.err (!%p152_p1)
}
 0x1e1   :  { %94 = dma.vmem_to_hbm [thread:$0]  %s92_s30, 128, %s218_s3, [#allocation4]  }
 0x1e2   :  { %158 = dma.done.wait [#allocation4], 128  }
 0x1e3   :  { %159 = vsyncadd [#allocation4], 4294967168 }
 0x1e4   :  { %98 = vsyncpa [#allocation3], 1 }
 0x1e5   :  { %99 = vsyncpa [#allocation4], 1 }

</bundles_post_ra>
